<compile_context>
chip_gen: v7x
topology: tpu7x:2x2x1
jax: 0.10.0
libtpu: 0.0.40
codegen_flags: <defaults>
</compile_context>

<pallas_src>
import functools
import math

import jax
import jax.numpy as jnp
from jax.experimental import pallas as pl
from jax.experimental.pallas import tpu as pltpu


# ----------------------------------------------------------------------------
# Kernel bodies: one (batch, query-tile) step covers every head at once.
# ----------------------------------------------------------------------------
def _attention_compute(q, k, v, mask, matmul_dtype):
    """q:(H,tq,dk) k:(H,Sk,dk) v:(H,Sk,dv) mask:(H,tq,Sk) int32 -> (out, p)."""
    d_k = q.shape[-1]
    scale = jnp.float32(1.0 / math.sqrt(d_k))

    # Pre-scale q (cheaper than dividing the (H, tq, Sk) score tile).
    q_scaled = q.astype(jnp.float32) * scale

    if matmul_dtype is not None:
        q_scaled = q_scaled.astype(matmul_dtype)
        k = k.astype(matmul_dtype)

    # Batched over heads -> MXU sees (tq x dk) @ (dk x Sk) per head in one op.
    scores = jnp.einsum(
        "hqd,hkd->hqk", q_scaled, k, preferred_element_type=jnp.float32
    )  # (H, tq, Sk) f32

    # masked_fill_(attention_mask, -1e9)
    scores = jnp.where(mask != 0, jnp.float32(-1.0e9), scores)

    # Softmax along the key axis (reciprocal on the EUP slot).
    m = jnp.max(scores, axis=-1, keepdims=True)
    e = jnp.exp(scores - m)
    s = jnp.sum(e, axis=-1, keepdims=True)
    p = e * pl.reciprocal(s, approx=True)  # (H, tq, Sk)

    pv_dtype = matmul_dtype if matmul_dtype is not None else v.dtype
    out = jnp.einsum(
        "hqk,hkd->hqd",
        p.astype(pv_dtype),
        v.astype(pv_dtype),
        preferred_element_type=jnp.float32,
    )  # (H, tq, dv) f32
    return out, p


def _attn_kernel_with_weights(q_ref, k_ref, v_ref, mask_ref, out_ref, w_ref,
                              *, matmul_dtype):
    out, p = _attention_compute(
        q_ref[0], k_ref[0], v_ref[0], mask_ref[0], matmul_dtype
    )
    out_ref[0] = out.astype(out_ref.dtype)
    w_ref[0] = p.astype(w_ref.dtype)


def _attn_kernel_no_weights(q_ref, k_ref, v_ref, mask_ref, out_ref,
                            *, matmul_dtype):
    out, _ = _attention_compute(
        q_ref[0], k_ref[0], v_ref[0], mask_ref[0], matmul_dtype
    )
    out_ref[0] = out.astype(out_ref.dtype)


# ----------------------------------------------------------------------------
# Wrapper
# ----------------------------------------------------------------------------
def _choose_q_tile(seq_q, target=256):
    """Largest multiple-of-8 divisor of seq_q that is <= target (or seq_q)."""
    if seq_q <= target:
        return seq_q
    for t in range(target, 7, -8):
        if seq_q % t == 0:
            return t
    return seq_q


def dot_product_attention(queries, keys, values, attention_mask, *,
                          q_tile=None, matmul_dtype=None, return_weights=True):
    """Fused scaled-dot-product attention.

    queries, keys : (B, H, Sq, d_k), (B, H, Sk, d_k)
    values        : (B, H, Sk, d_v)
    attention_mask: broadcastable to (B, H, Sq, Sk); True/nonzero == masked.
    Returns (out, weights) like the PyTorch module (or just out when
    return_weights=False).
    """
    B, H, Sq, dk = queries.shape
    Sk = keys.shape[2]
    dv = values.shape[3]

    mask = jnp.broadcast_to(attention_mask, (B, H, Sq, Sk)).astype(jnp.int32)

    tq = q_tile if q_tile is not None else _choose_q_tile(Sq)
    assert Sq % tq == 0
    grid = (B, Sq // tq)

    in_specs = [
        pl.BlockSpec((1, H, tq, dk), lambda b, qi: (b, 0, qi, 0)),   # q tile
        pl.BlockSpec((1, H, Sk, dk), lambda b, qi: (b, 0, 0, 0)),    # all keys
        pl.BlockSpec((1, H, Sk, dv), lambda b, qi: (b, 0, 0, 0)),    # all values
        pl.BlockSpec((1, H, tq, Sk), lambda b, qi: (b, 0, qi, 0)),   # mask tile
    ]

    out_dtype = queries.dtype
    if return_weights:
        kernel = functools.partial(_attn_kernel_with_weights,
                                   matmul_dtype=matmul_dtype)
        out_shape = (
            jax.ShapeDtypeStruct((B, H, Sq, dv), out_dtype),
            jax.ShapeDtypeStruct((B, H, Sq, Sk), out_dtype),
        )
        out_specs = [
            pl.BlockSpec((1, H, tq, dv), lambda b, qi: (b, 0, qi, 0)),
            pl.BlockSpec((1, H, tq, Sk), lambda b, qi: (b, 0, qi, 0)),
        ]
    else:
        kernel = functools.partial(_attn_kernel_no_weights,
                                   matmul_dtype=matmul_dtype)
        out_shape = jax.ShapeDtypeStruct((B, H, Sq, dv), out_dtype)
        out_specs = pl.BlockSpec((1, H, tq, dv), lambda b, qi: (b, 0, qi, 0))

    # Explicit VMEM budget (block bytes x double-buffering, with headroom),
    # clipped so it is valid on v5e (16 MiB default scope) and v7x (64 MiB
    # physical per TensorCore).
    itemsize = 4  # f32 / int32 blocks
    block_bytes = itemsize * (
        H * tq * dk          # q
        + H * Sk * dk        # k
        + H * Sk * dv        # v
        + H * tq * Sk        # mask
        + H * tq * dv        # out
        + (H * tq * Sk if return_weights else 0)  # weights
    )
    vmem_limit = int(min(64 * 1024 * 1024,
                         max(32 * 1024 * 1024, 4 * block_bytes)))

    result = pl.pallas_call(
        kernel,
        out_shape=out_shape,
        grid=grid,
        in_specs=in_specs,
        out_specs=out_specs,
        compiler_params=pltpu.CompilerParams(
            dimension_semantics=("parallel", "parallel"),
            vmem_limit_bytes=vmem_limit,
        ),
    )(queries, keys, values, mask)

    return result


# ----------------------------------------------------------------------------
# Demo / self-check
# ----------------------------------------------------------------------------
if __name__ == "__main__":
    batch, n_heads, seq, d_k, d_v = 2, 4, 8, 8, 8

    root = jax.random.PRNGKey(0)
    kq, kk, kv = jax.random.split(root, 3)
    q = jax.random.normal(kq, (batch, n_heads, seq, d_k), jnp.float32)
    k = jax.random.normal(kk, (batch, n_heads, seq, d_k), jnp.float32)
    v = jax.random.normal(kv, (batch, n_heads, seq, d_v), jnp.float32)

    # Causal mask: True == masked (same semantics as torch masked_fill_).
    causal = jnp.triu(jnp.ones((seq, seq), jnp.bool_), k=1)
    attention_mask = jnp.broadcast_to(
        causal[None, None, :, :], (batch, n_heads, seq, seq)
    )

    # f32 path (exact semantics of the reference module).
    out, weights = dot_product_attention(q, k, v, attention_mask)
    jax.block_until_ready((out, weights))

    # Pure-JAX reference (high precision) for a sanity check.
    hp = jax.lax.Precision.HIGHEST
    ref_scores = jnp.einsum("bhqd,bhkd->bhqk", q, k, precision=hp)
    ref_scores = ref_scores / jnp.sqrt(jnp.float32(d_k))
    ref_scores = jnp.where(attention_mask, jnp.float32(-1.0e9), ref_scores)
    ref_w = jax.nn.softmax(ref_scores, axis=-1)
    ref_out = jnp.einsum("bhqk,bhkd->bhqd", ref_w, v, precision=hp)

    assert out.shape == (batch, n_heads, seq, d_v)
    assert weights.shape == (batch, n_heads, seq, seq)
    assert bool(jnp.all(jnp.isfinite(out))) and bool(jnp.all(jnp.isfinite(weights)))
    assert jnp.allclose(out, ref_out, atol=2e-2, rtol=2e-2)
    assert jnp.allclose(weights, ref_w, atol=2e-2, rtol=2e-2)

    # bf16 MXU fast path (f32 accumulation) — looser tolerance.
    out_bf16, w_bf16 = dot_product_attention(
        q, k, v, attention_mask, matmul_dtype=jnp.bfloat16
    )
    jax.block_until_ready((out_bf16, w_bf16))
    assert jnp.allclose(out_bf16, ref_out, atol=5e-2, rtol=5e-2)

    # Output-only path (skips the O(S^2) attention-weights HBM writeback).
    out_only = dot_product_attention(
        q, k, v, attention_mask, return_weights=False
    )
    jax.block_until_ready(out_only)
    assert jnp.allclose(out_only, ref_out, atol=2e-2, rtol=2e-2)

    print("KERNEL_OK")
</pallas_src>

<mosaic_0001>
module attributes {stable_mosaic.version = 11 : i64} {
  func.func @_attn_kernel_with_weights(%arg0: i32, %arg1: i32, %arg2: memref<1x4x8x8xf32, #tpu.memory_space<vmem>>, %arg3: memref<1x4x8x8xf32, #tpu.memory_space<vmem>>, %arg4: memref<1x4x8x8xf32, #tpu.memory_space<vmem>>, %arg5: memref<1x4x8x8xi32, #tpu.memory_space<vmem>>, %arg6: memref<1x4x8x8xf32, #tpu.memory_space<vmem>>, %arg7: memref<1x4x8x8xf32, #tpu.memory_space<vmem>>) attributes {dimension_semantics = [#tpu.dimension_semantics<parallel>, #tpu.dimension_semantics<parallel>], iteration_bounds = array<i64: 2, 1>, scalar_prefetch = 0 : i64, scratch_operands = 0 : i64, tpu.core_type = #tpu.core_type<tc>, window_params = [{transform_indices = @transform_0, window_bounds = array<i64: 1, 4, 8, 8>}, {transform_indices = @transform_1, window_bounds = array<i64: 1, 4, 8, 8>}, {transform_indices = @transform_2, window_bounds = array<i64: 1, 4, 8, 8>}, {transform_indices = @transform_3, window_bounds = array<i64: 1, 4, 8, 8>}, {transform_indices = @transform_4, window_bounds = array<i64: 1, 4, 8, 8>}, {transform_indices = @transform_5, window_bounds = array<i64: 1, 4, 8, 8>}]} {
    %c0 = arith.constant 0 : index
    %c0_0 = arith.constant 0 : index
    %c0_1 = arith.constant 0 : index
    %c0_2 = arith.constant 0 : index
    %0 = vector.load %arg2[%c0, %c0_0, %c0_1, %c0_2] : memref<1x4x8x8xf32, #tpu.memory_space<vmem>>, vector<1x4x8x8xf32>
    %1 = vector.shape_cast %0 : vector<1x4x8x8xf32> to vector<4x8x8xf32>
    %c0_3 = arith.constant 0 : index
    %c0_4 = arith.constant 0 : index
    %c0_5 = arith.constant 0 : index
    %c0_6 = arith.constant 0 : index
    %2 = vector.load %arg3[%c0_3, %c0_4, %c0_5, %c0_6] : memref<1x4x8x8xf32, #tpu.memory_space<vmem>>, vector<1x4x8x8xf32>
    %3 = vector.shape_cast %2 : vector<1x4x8x8xf32> to vector<4x8x8xf32>
    %c0_7 = arith.constant 0 : index
    %c0_8 = arith.constant 0 : index
    %c0_9 = arith.constant 0 : index
    %c0_10 = arith.constant 0 : index
    %4 = vector.load %arg4[%c0_7, %c0_8, %c0_9, %c0_10] : memref<1x4x8x8xf32, #tpu.memory_space<vmem>>, vector<1x4x8x8xf32>
    %5 = vector.shape_cast %4 : vector<1x4x8x8xf32> to vector<4x8x8xf32>
    %c0_11 = arith.constant 0 : index
    %c0_12 = arith.constant 0 : index
    %c0_13 = arith.constant 0 : index
    %c0_14 = arith.constant 0 : index
    %6 = vector.load %arg5[%c0_11, %c0_12, %c0_13, %c0_14] : memref<1x4x8x8xi32, #tpu.memory_space<vmem>>, vector<1x4x8x8xi32>
    %7 = vector.shape_cast %6 : vector<1x4x8x8xi32> to vector<4x8x8xi32>
    %cst = arith.constant 0.353553385 : f32
    %8 = vector.broadcast %cst : f32 to vector<4x8x8xf32>
    %9 = arith.mulf %1, %8 : vector<4x8x8xf32>
    "tpu.trace_start"() <{level = 10 : i32, message = "hqd,hkd->hqk"}> : () -> ()
    %cst_15 = arith.constant dense<0.000000e+00> : vector<4x8x8xf32>
    %10 = tpu.matmul %9, %3, %cst_15 {dimension_numbers = #tpu.dot_dimension_numbers<[2], [2], [1], [1], [0, 0, 0, 1, 1, 1], [0], [0]>} : vector<4x8x8xf32>, vector<4x8x8xf32>, vector<4x8x8xf32> -> vector<4x8x8xf32>
    %c0_i32 = arith.constant 0 : i32
    "tpu.trace_stop"() : () -> ()
    %11 = vector.broadcast %c0_i32 : i32 to vector<4x8x8xi32>
    %12 = arith.cmpi ne, %7, %11 : vector<4x8x8xi32>
    %cst_16 = arith.constant -1.000000e+09 : f32
    %13 = vector.broadcast %cst_16 : f32 to vector<4x8x8xf32>
    %14 = arith.select %12, %13, %10 : vector<4x8x8xi1>, vector<4x8x8xf32>
    %cst_17 = arith.constant dense<0xFF800000> : vector<4x8xf32>
    %15 = vector.multi_reduction <maximumf>, %14, %cst_17 [2] : vector<4x8x8xf32> to vector<4x8xf32>
    %16 = vector.shape_cast %15 : vector<4x8xf32> to vector<4x8x1xf32>
    %17 = vector.broadcast %16 : vector<4x8x1xf32> to vector<4x8x8xf32>
    %18 = arith.subf %14, %17 : vector<4x8x8xf32>
    %19 = math.exp %18 : vector<4x8x8xf32>
    %cst_18 = arith.constant dense<0.000000e+00> : vector<4x8xf32>
    %20 = vector.multi_reduction <add>, %19, %cst_18 [2] : vector<4x8x8xf32> to vector<4x8xf32>
    %21 = vector.shape_cast %20 : vector<4x8xf32> to vector<4x8x1xf32>
    %22 = tpu.reciprocal %21 {approx = true} : vector<4x8x1xf32> -> vector<4x8x1xf32>
    %23 = vector.broadcast %22 : vector<4x8x1xf32> to vector<4x8x8xf32>
    %24 = arith.mulf %19, %23 : vector<4x8x8xf32>
    "tpu.trace_start"() <{level = 10 : i32, message = "hqk,hkd->hqd"}> : () -> ()
    %cst_19 = arith.constant dense<0.000000e+00> : vector<4x8x8xf32>
    %25 = tpu.matmul %24, %5, %cst_19 {dimension_numbers = #tpu.dot_dimension_numbers<[2], [1], [1], [2], [0, 0, 0, 1, 1, 2], [0], [0]>} : vector<4x8x8xf32>, vector<4x8x8xf32>, vector<4x8x8xf32> -> vector<4x8x8xf32>
    "tpu.trace_stop"() : () -> ()
    %c0_20 = arith.constant 0 : index
    %c0_21 = arith.constant 0 : index
    %c0_22 = arith.constant 0 : index
    %c0_23 = arith.constant 0 : index
    %26 = vector.load %arg6[%c0_20, %c0_21, %c0_22, %c0_23] : memref<1x4x8x8xf32, #tpu.memory_space<vmem>>, vector<1x4x8x8xf32>
    %27 = vector.shape_cast %26 : vector<1x4x8x8xf32> to vector<4x8x8xf32>
    %28 = vector.shape_cast %25 : vector<4x8x8xf32> to vector<1x4x8x8xf32>
    tpu.vector_store %arg6[%c0_20, %c0_21, %c0_22, %c0_23], %28 {strides = array<i32>} : memref<1x4x8x8xf32, #tpu.memory_space<vmem>>, vector<1x4x8x8xf32>,
    %c0_24 = arith.constant 0 : index
    %c0_25 = arith.constant 0 : index
    %c0_26 = arith.constant 0 : index
    %c0_27 = arith.constant 0 : index
    %29 = vector.load %arg7[%c0_24, %c0_25, %c0_26, %c0_27] : memref<1x4x8x8xf32, #tpu.memory_space<vmem>>, vector<1x4x8x8xf32>
    %30 = vector.shape_cast %29 : vector<1x4x8x8xf32> to vector<4x8x8xf32>
    %31 = vector.shape_cast %24 : vector<4x8x8xf32> to vector<1x4x8x8xf32>
    tpu.vector_store %arg7[%c0_24, %c0_25, %c0_26, %c0_27], %31 {strides = array<i32>} : memref<1x4x8x8xf32, #tpu.memory_space<vmem>>, vector<1x4x8x8xf32>,
    return
  }
  func.func @transform_0(%arg0: i32, %arg1: i32) -> (i32, i32, i32, i32) {
    %c0_i32 = arith.constant 0 : i32
    %c0_i32_0 = arith.constant 0 : i32
    %c0_i32_1 = arith.constant 0 : i32
    return %arg0, %c0_i32, %arg1, %c0_i32_0 : i32, i32, i32, i32
  }
  func.func @transform_1(%arg0: i32, %arg1: i32) -> (i32, i32, i32, i32) {
    %c0_i32 = arith.constant 0 : i32
    %c0_i32_0 = arith.constant 0 : i32
    %c0_i32_1 = arith.constant 0 : i32
    %c0_i32_2 = arith.constant 0 : i32
    return %arg0, %c0_i32, %c0_i32_0, %c0_i32_1 : i32, i32, i32, i32
  }
  func.func @transform_2(%arg0: i32, %arg1: i32) -> (i32, i32, i32, i32) {
    %c0_i32 = arith.constant 0 : i32
    %c0_i32_0 = arith.constant 0 : i32
    %c0_i32_1 = arith.constant 0 : i32
    %c0_i32_2 = arith.constant 0 : i32
    return %arg0, %c0_i32, %c0_i32_0, %c0_i32_1 : i32, i32, i32, i32
  }
  func.func @transform_3(%arg0: i32, %arg1: i32) -> (i32, i32, i32, i32) {
    %c0_i32 = arith.constant 0 : i32
    %c0_i32_0 = arith.constant 0 : i32
    %c0_i32_1 = arith.constant 0 : i32
    return %arg0, %c0_i32, %arg1, %c0_i32_0 : i32, i32, i32, i32
  }
  func.func @transform_4(%arg0: i32, %arg1: i32) -> (i32, i32, i32, i32) {
    %c0_i32 = arith.constant 0 : i32
    %c0_i32_0 = arith.constant 0 : i32
    %c0_i32_1 = arith.constant 0 : i32
    return %arg0, %c0_i32, %arg1, %c0_i32_0 : i32, i32, i32, i32
  }
  func.func @transform_5(%arg0: i32, %arg1: i32) -> (i32, i32, i32, i32) {
    %c0_i32 = arith.constant 0 : i32
    %c0_i32_0 = arith.constant 0 : i32
    %c0_i32_1 = arith.constant 0 : i32
    return %arg0, %c0_i32, %arg1, %c0_i32_0 : i32, i32, i32, i32
  }
}

</mosaic_0001>

<bundles_post_ra>
// kernel: tpu_custom_call.1
= control target key start
LH: loop header
LB: loop body
LE: loop exit
PB: predicated region body
PF: predicated region fallthrough
CT: control target
= control target key end

     0   :  { %s2226_s0 = inlined_call_operand.hbm [shape: f32[2,4,8,8], index: 0, kind: input, shape index: {}]   ;;  %s2227_s1 = inlined_call_operand.hbm [shape: f32[2,4,8,8], index: 1, kind: input, shape index: {}]   ;;  %s2228_s2 = inlined_call_operand.hbm [shape: f32[2,4,8,8], index: 2, kind: input, shape index: {}]   ;;  %s2229_s3 = inlined_call_operand.hbm [shape: s32[2,4,8,8], index: 3, kind: input, shape index: {}]   ;;  %s2230_s4 = inlined_call_operand.hbm [shape: f32[2,4,8,8], index: 4, kind: output, shape index: {0}]   ;;  %s2231_s5 = inlined_call_operand.hbm [shape: f32[2,4,8,8], index: 5, kind: output, shape index: {1}]  }
   0x1   :  { %2244 = sst [smem:[#allocation24_spill]] %s2226_s0 }
   0x2   :  { %2245 = sst [smem:[#allocation25_spill]] %s2227_s1 }
   0x3   :  { %11 = vsyncpa [#allocation3], 0 }
   0x4   :  { %13 = vsyncpa [#allocation3 + $0x1], 0 }
   0x5   :  { %14 = vsyncpa [#allocation6], 0 }
   0x6   :  { %16 = vsyncpa [#allocation6 + $0x1], 0 }
   0x7   :  { %17 = vsyncpa [#allocation9], 0 }
   0x8   :  { %19 = vsyncpa [#allocation9 + $0x1], 0 }
   0x9   :  { %20 = vsyncpa [#allocation4], 0 }
   0xa   :  { %22 = vsyncpa [#allocation4 + $0x1], 0 }
   0xb   :  { %23 = vsyncpa [#allocation12], 0 }
   0xc   :  { %25 = vsyncpa [#allocation12 + $0x1], 0  ;;  %s1789_s18 = smov 0   ;;  %s1791_s19 = smov 0  }
   0xd   :  { %s1793_s20 = smov 0   ;;  %s1795_s21 = smov 0  }
   0xe   :  { %s1797_s22 = smov 0   ;;  %s1799_s23 = smov 0  }
   0xf LB: > { %2246 = sst [smem:[#allocation18_spill]] %s1733_s20  ;;  %s1820_s24 = sadd.s32 4294967295, %s1745_s23   ;;  %s1745_s23 = sphi %s1799_s23, %s31_s23   ;;  %s1741_s22 = sphi %s1797_s22, %s2275_s22   ;;  %s1737_s21 = sphi %s1795_s21, %s2274_s21   ;;  %s1733_s20 = sphi %s1793_s20, %s2273_s20   ;;  %s1729_s19 = sphi %s1791_s19, %s2277_s19   ;;  %s1725_s18 = sphi %s1789_s18, %s2276_s18  }
  0x10   : > { %2247 = sst [smem:[#allocation19_spill]] %s1741_s22  ;;  %s1295_s25 = sadd.s32 4294967294, %s1745_s23  }
  0x11   : > { %2248 = sst [smem:[#allocation20_spill]] %s1745_s23  ;;  %s43_s26 = sadd.s32 1, %s1741_s22 }
  0x12   : > { %s52_s27 = sadd.s32 1, %s1733_s20  ;;  %p45_p0 = scmp.ge.s32.totalorder %s43_s26, 2 }
  0x13   : > { %p59_p1 = scmp.ne.s32.totalorder %s1733_s20, %s1729_s19  ;;  %p60_p2 = scmp.eq.s32.totalorder %s1745_s23, 0 }
  0x14   : > { %p65_p3 = scmp.ne.s32.totalorder %s1729_s19, %s1725_s18  ;;  %s2279_s26 = smov (%p45_p0, %s43_s26), 0 }
  0x15   : > { %2249 = sst [smem:[#allocation21_spill]] %s2279_s26  ;;  %p1832_p4 = por %p60_p2, %p59_p1 }
  0x16   : > { %p66_p5 = scmp.eq.s32.totalorder %s1820_s24, 0  ;;  %s47_s29 = ssub.s32 %s1741_s22, %s2279_s26 }
  0x17   : > { %p171_p6 = scmp.eq.s32.totalorder %s1820_s24, 1  ;;  %p50_p7 = scmp.eq.s32.totalorder %s47_s29, 0 }
  0x18   : > { %p1840_p8 = por %p66_p5, %p65_p3  ;;  %p177_p10 = scmp.eq.s32.totalorder %s1295_s25, 1 }
  0x19   : > { %p1844_p9 = por %p171_p6, %p59_p1  ;;  %p1431_p13 = scmp.lt.s32.totalorder %s1745_s23, 2 }
  0x1a   : > { %s2251_s30 = scalar_select %p1840_p8, 1, 0 }
  0x1b   : > { %s2252_s6 = scalar_select %p1844_p9, 1, 0 }
  0x1c   : > { %s1849_s7 = scalar_select %p50_p7, %s1733_s20, %s52_s27  }
  0x1d   : > { %p1851_p11 = por %p177_p10, %p65_p3  ;;  %s1858_s9 = sand.u32 1, %s1733_s20  }
  0x1e   : > { %2253 = sst [smem:[#allocation22_spill]] %s1849_s7  ;;  %s1861_s10 = sshll.u32 %s1858_s9, 5 }
  0x1f   : > { %s2254_s8 = scalar_select %p1851_p11, 1, 0 }
  0x20   : > { %s1864_s11 = sshll.u32 %s1741_s22, 9  ;;  %p1868_p0 = pnand %p1431_p13, %p1832_p4 }
  0x21   : > { %2255 = sst [smem:[#allocation23_spill]] %s2254_s8  ;;  %s247_s13 = sand.u32 1, %s1745_s23  }
  0x22   : > { %s2257_s1 = sld [smem:[#allocation25_spill]]  ;;  %s251_s17 = scalar_lea.vmem [#allocation5], %s1861_s10 }
  0x23   : > { %s258_s25 = sshll.u32 %s251_s17, 4  ;;  %s1884_s27 = scalar_lea.sflag [#allocation6], %s247_s13  ;;  %s1881_s25 = int_to_ptr.vmem [resolvable:$true] %s258_s25 }
  0x24   : > { %p1890_p4 = pneg %p1868_p0 }
  0x28   : > { %s1877_s16 = scalar_lea.hbm %s2257_s1, %s1864_s11  ;;  %s1508_s17 = scalar_lea.hbm %s2257_s1, 1024 }
  0x29   : > { %s1503_s28 = scalar_lea.hbm %s1877_s16, 512  ;;  %p1509_p7 = scmp.lt.u32.totalorder %s1877_s16, %s2257_s1 }
  0x2a   : > { %p1504_p3 = scmp.ne.s32.totalorder %s1877_s16, %s1503_s28  ;;  %p1510_p10 = scmp.lt.u32.totalorder %s1508_s17, %s1503_s28 }
  0x2b   : > { %p1512_p12 = scmp.lt.u32.totalorder %s1503_s28, %s1877_s16 }
  0x2c   : > { %p1506_p5 = pnand %p1890_p4, %p1504_p3  ;;  %p1511_p13 = por %p1510_p10, %p1509_p7 }
  0x2e   : > { %p1507_p6 = pneg %p1506_p5  ;;  %p1513_p1 = por %p1512_p12, %p1511_p13 }
  0x30   : > { %p1514_p2 = pnand %p1513_p1, %p1507_p6 }
  0x32   : > { %1517 = shalt.err (!%p1514_p2)
}
  0x33   : > { %s1518_s13 = scalar_lea.vmem %s1881_s25, 512  ;;  %s1747_s14 = smov [#allocation5]  }
  0x34   : > { %p1519_p3 = scmp.ne.s32.totalorder %s1881_s25, %s1518_s13  ;;  %s1523_s15 = sshll.u32 %s1747_s14, 4  ;;  %s1524_s15 = int_to_ptr.vmem [resolvable:$false] %s1523_s15 }
  0x35   : > { %s1525_s22 = scalar_lea.vmem %s1524_s15, 1024  ;;  %p1526_p9 = scmp.lt.s32.totalorder %s1881_s25, %s1524_s15 }
  0x36   : > { %p1521_p5 = pnand %p1519_p3, %p1890_p4  ;;  %p1527_p8 = scmp.lt.s32.totalorder %s1525_s22, %s1518_s13 }
  0x38   : > { %p1522_p11 = pneg %p1521_p5  ;;  %p1528_p7 = por %p1527_p8, %p1526_p9 }
  0x3a   : > { %p1529_p10 = pnand %p1528_p7, %p1522_p11 }
  0x3c   : > { %1532 = shalt.err (!%p1529_p10)
}
  0x3d   : > { %s2236_s26 = smov 128   ;;  %s2238_s28 = smov 8  }
  0x3e   : > { %1417 = dma.hbm_to_vmem [thread:$0]  (!%p1868_p0), %s1877_s16, 512, %s1881_s25, %s1884_s27, %s2236_s26, %s2236_s26, %s2238_s28  }
  0x3f   : > { %p2259_p8 = scmp.lt.s32.totalorder %s1745_s23, 3  ;;  %p2260_p9 = scmp.ge.s32.totalorder %s1745_s23, 1 }
  0x40   : > { %s2262_s0 = sld [smem:[#allocation24_spill]]  ;;  %s229_s22 = scalar_lea.vmem [#allocation2], %s1861_s10 }
  0x41   : > { %p1921_p11 = pnand %p2260_p9, %p2259_p8  ;;  %s237_s1 = sshll.u32 %s229_s22, 4  ;;  %s1932_s1 = int_to_ptr.vmem [resolvable:$true] %s237_s1 }
  0x42   : > { %s1938_s26 = scalar_lea.hbm %s2228_s2, %s1864_s11  ;;  %s226_s28 = scalar_lea.sflag [#allocation3], %s1858_s9 }
  0x43   : > { %s2261_s17 = scalar_select %p1921_p11, 1, 0 }
  0x46   : > { %s1929_s15 = scalar_lea.hbm %s2262_s0, %s1864_s11  ;;  %s1538_s20 = scalar_lea.hbm %s2262_s0, 1024 }
  0x47   : > { %s1533_s7 = scalar_lea.hbm %s1929_s15, 512  ;;  %p1539_p6 = scmp.lt.u32.totalorder %s1929_s15, %s2262_s0 }
  0x48   : > { %p1534_p12 = scmp.ne.s32.totalorder %s1929_s15, %s1533_s7  ;;  %p1540_p13 = scmp.lt.u32.totalorder %s1538_s20, %s1533_s7 }
  0x49   : > { %p1542_p5 = scmp.lt.u32.totalorder %s1533_s7, %s1929_s15 }
  0x4a   : > { %p1536_p1 = pnand %p1534_p12, %p1890_p4  ;;  %p1541_p3 = por %p1540_p13, %p1539_p6 }
  0x4c   : > { %p1537_p2 = pneg %p1536_p1  ;;  %p1543_p7 = por %p1542_p5, %p1541_p3 }
  0x4e   : > { %p1544_p10 = pnand %p1543_p7, %p1537_p2 }
  0x50   : > { %1547 = shalt.err (!%p1544_p10)
}
  0x51   : > { %s1548_s22 = scalar_lea.vmem %s1932_s1, 512  ;;  %s1750_s16 = smov [#allocation2]  }
  0x52   : > { %p1549_p8 = scmp.ne.s32.totalorder %s1932_s1, %s1548_s22  ;;  %s1553_s25 = sshll.u32 %s1750_s16, 4  ;;  %s1554_s25 = int_to_ptr.vmem [resolvable:$false] %s1553_s25 }
  0x53   : > { %s1555_s23 = scalar_lea.vmem %s1554_s25, 1024  ;;  %p1556_p1 = scmp.lt.s32.totalorder %s1932_s1, %s1554_s25 }
  0x54   : > { %p1551_p9 = pnand %p1549_p8, %p1890_p4  ;;  %p1557_p11 = scmp.lt.s32.totalorder %s1555_s23, %s1548_s22 }
  0x56   : > { %p1552_p12 = pneg %p1551_p9  ;;  %p1558_p6 = por %p1557_p11, %p1556_p1 }
  0x58   : > { %p1559_p13 = pnand %p1558_p6, %p1552_p12 }
  0x5a   : > { %1562 = shalt.err (!%p1559_p13)
}
  0x5b   : > { %s2263_s20 = smov 8   ;;  %s2264_s7 = smov 128  }
  0x5c   : > { %1414 = dma.hbm_to_vmem [thread:$0]  (!%p1868_p0), %s1929_s15, 512, %s1932_s1, %s226_s28, %s2264_s7, %s2264_s7, %s2263_s20  }
  0x5d   : > { %s272_s8 = scalar_lea.vmem [#allocation7], %s1861_s10  ;;  %s1563_s14 = scalar_lea.hbm %s1938_s26, 512 }
  0x5e   : > { %s279_s13 = sshll.u32 %s272_s8, 4  ;;  %p1564_p11 = scmp.ne.s32.totalorder %s1938_s26, %s1563_s14  ;;  %s1968_s13 = int_to_ptr.vmem [resolvable:$true] %s279_s13 }
  0x5f   : > { %s1568_s25 = scalar_lea.hbm %s2228_s2, 1024  ;;  %p1569_p5 = scmp.lt.u32.totalorder %s1938_s26, %s2228_s2 }
  0x60   : > { %p1566_p2 = pnand %p1564_p11, %p1890_p4  ;;  %p1570_p7 = scmp.lt.u32.totalorder %s1568_s25, %s1563_s14 }
  0x61   : > { %p1572_p8 = scmp.lt.u32.totalorder %s1563_s14, %s1938_s26 }
  0x62   : > { %p1567_p3 = pneg %p1566_p2  ;;  %p1571_p10 = por %p1570_p7, %p1569_p5 }
  0x64   : > { %p1573_p9 = por %p1572_p8, %p1571_p10 }
  0x66   : > { %p1574_p12 = pnand %p1573_p9, %p1567_p3 }
  0x68   : > { %1577 = shalt.err (!%p1574_p12)
}
  0x69   : > { %s1578_s1 = scalar_lea.vmem %s1968_s13, 512  ;;  %s1751_s28 = smov [#allocation7]  }
  0x6a   : > { %p1579_p1 = scmp.ne.s32.totalorder %s1968_s13, %s1578_s1  ;;  %s1583_s15 = sshll.u32 %s1751_s28, 4  ;;  %s1584_s15 = int_to_ptr.vmem [resolvable:$false] %s1583_s15 }
  0x6b   : > { %s1585_s0 = scalar_lea.vmem %s1584_s15, 1024  ;;  %p1586_p11 = scmp.lt.s32.totalorder %s1968_s13, %s1584_s15 }
  0x6c   : > { %p1581_p6 = pnand %p1579_p1, %p1890_p4  ;;  %p1587_p2 = scmp.lt.s32.totalorder %s1585_s0, %s1578_s1 }
  0x6e   : > { %p1582_p13 = pneg %p1581_p6  ;;  %p1588_p5 = por %p1587_p2, %p1586_p11 }
  0x70   : > { %p1589_p7 = pnand %p1588_p5, %p1582_p13 }
  0x72   : > { %1592 = shalt.err (!%p1589_p7)
}
  0x73   : > { %1420 = dma.hbm_to_vmem [thread:$0]  (!%p1868_p0), %s1938_s26, 512, %s1968_s13, %s1884_s27, %s2264_s7, %s2264_s7, %s2263_s20  }
  0x74   : > { %s1999_s22 = scalar_lea.hbm %s2229_s3, %s1864_s11  ;;  %s293_s16 = scalar_lea.vmem [#allocation8], %s1861_s10 }
  0x75   : > { %s301_s25 = sshll.u32 %s293_s16, 4  ;;  %s290_s23 = scalar_lea.sflag [#allocation9], %s1858_s9  ;;  %s2002_s25 = int_to_ptr.vmem [resolvable:$true] %s301_s25 }
  0x76   : > { %s1593_s1 = scalar_lea.hbm %s1999_s22, 512  ;;  %s1598_s13 = scalar_lea.hbm %s2229_s3, 1024 }
  0x77   : > { %p1594_p3 = scmp.ne.s32.totalorder %s1999_s22, %s1593_s1  ;;  %p1599_p9 = scmp.lt.u32.totalorder %s1999_s22, %s2229_s3 }
  0x78   : > { %p1600_p12 = scmp.lt.u32.totalorder %s1598_s13, %s1593_s1  ;;  %p1602_p6 = scmp.lt.u32.totalorder %s1593_s1, %s1999_s22 }
  0x79   : > { %p1596_p10 = pnand %p1594_p3, %p1890_p4 }
  0x7a   : > { %p1601_p1 = por %p1600_p12, %p1599_p9 }
  0x7b   : > { %p1597_p8 = pneg %p1596_p10 }
  0x7c   : > { %p1603_p13 = por %p1602_p6, %p1601_p1 }
  0x7e   : > { %p1604_p11 = pnand %p1603_p13, %p1597_p8 }
  0x80   : > { %1607 = shalt.err (!%p1604_p11)
}
  0x81   : > { %s1608_s10 = scalar_lea.vmem %s2002_s25, 512  ;;  %s1752_s15 = smov [#allocation8]  }
  0x82   : > { %p1609_p2 = scmp.ne.s32.totalorder %s2002_s25, %s1608_s10  ;;  %s1613_s0 = sshll.u32 %s1752_s15, 4  ;;  %s1614_s0 = int_to_ptr.vmem [resolvable:$false] %s1613_s0 }
  0x83   : > { %s1615_s8 = scalar_lea.vmem %s1614_s0, 1024  ;;  %p1616_p3 = scmp.lt.s32.totalorder %s2002_s25, %s1614_s0 }
  0x84   : > { %p1611_p5 = pnand %p1609_p2, %p1890_p4  ;;  %p1617_p10 = scmp.lt.s32.totalorder %s1615_s8, %s1608_s10 }
  0x86   : > { %p1612_p7 = pneg %p1611_p5  ;;  %p1618_p9 = por %p1617_p10, %p1616_p3 }
  0x88   : > { %p1619_p12 = pnand %p1618_p9, %p1612_p7 }
  0x8a   : > { %1622 = shalt.err (!%p1619_p12)
}
  0x8b   : > { %1423 = dma.hbm_to_vmem [thread:$0]  (!%p1868_p0), %s1999_s22, 512, %s2002_s25, %s290_s23, %s2264_s7, %s2264_s7, %s2263_s20  }
  0x8c   : > { %p2265_p4 = scmp.ne.s32.totalorder %s2261_s17, 0 }
  0x8d   : > { %s2034_s29 = sand.u32 (!%p2265_p4), 1, %s1729_s19   ;;  %p2266_p8 = scmp.ne.s32.totalorder (!%p2265_p4), %s2251_s30, 0 }
  0x8e   : > { %313 = sbr.rel (%p2265_p4) target bundleno = 923 (0x39b), region = 36  ;;  %s2037_s14 = sshll.u32 (!%p2265_p4), %s2034_s29, 5 }
  0x8f   : > { %s316_s12 = scalar_lea.sflag (!%p2265_p4), [#allocation3], %s2034_s29  ;;  %s2041_s16 = scalar_lea.vmem (!%p2265_p4), [#allocation2], %s2037_s14 }
  0x95   : > { %1704 = dma.done.wait (%p2266_p8), %s316_s12, 512  }
  0x96   : > { %1706 = vsyncadd (%p2266_p8), %s316_s12, 4294966784  ;;  %s324_s9 = sand.u32 1, %s1820_s24   ;;  %s328_s20 = scalar_lea.vmem [#allocation5], %s2037_s14 }
  0x97   : > { %s325_s17 = scalar_lea.sflag [#allocation6], %s324_s9 }
  0x98   : > { %1708 = dma.done.wait (%p2266_p8), %s325_s17, 1024  }
  0x99   : > { %1710 = vsyncadd (%p2266_p8), %s325_s17, 4294966272  ;;  %s2054_s7 = scalar_lea.vmem [#allocation7], %s2037_s14  ;;  %s343_s22 = scalar_lea.sflag [#allocation9], %s2034_s29 }
  0x9a   : > { %s2058_s25 = scalar_lea.vmem [#allocation8], %s2037_s14 }
  0x9b   : > { %1712 = dma.done.wait (%p2266_p8), %s343_s22, 512  }
  0x9c   : > { %1714 = vsyncadd (%p2266_p8), %s343_s22, 4294966784  ;;  %v1753_v0 = vmov 0.0   ;;  %vm1754_vm0 = vmmov 0   ;;  %vm413_vm1 = vcmask 64512   ;;  %v397_v1 = vld [vmem:[%s328_s20] sm:$0xff]  ;;  %v398_v3 = vld [vmem:[%s328_s20 + $0x8] sm:$0xff] }
  0x9d   : > { %1359 = vmatprep.subr.mxu0 %v1753_v0  ;;  %1361 = vmatprep.mubr.msk.f32.mxu0 %vm1754_vm0, %v1753_v0  ;;  %v393_v2 = vld [vmem:[%s2041_s16] sm:$0xff]  ;;  %v394_v5 = vld [vmem:[%s2041_s16 + $0x8] sm:$0xff]  ;;  %v395_v6 = vld [vmem:[%s2041_s16 + $0x10] sm:$0xff]  ;;  %s392_s24 = scalar_lea.vmem [#allocation11], %s2037_s14  ;;  %s1341_s30 = sshll.u32 %s1737_s21, 9 }
  0x9e   : > { %1364 = vmatprep.subr.mxu1 %v1753_v0  ;;  %1366 = vmatprep.mubr.msk.f32.mxu1 %vm1754_vm0, %v1753_v0  ;;  %v409_v4 = vmul.f32 0.35355338, %v393_v2  ;;  %v399_v7 = vld [vmem:[%s328_s20 + $0x10] sm:$0xff]  ;;  %v410_v8 = vmul.f32 0.35355338, %v394_v5  ;;  %v396_v9 = vld [vmem:[%s2041_s16 + $0x18] sm:$0xff]  ;;  %s2131_s27 = scalar_lea.hbm %s2231_s5, %s1341_s30 }
  0x9f   : > { %1360 = vmatpush3.xpose.msk.msra.mxu0 %vm413_vm1, %v397_v1  ;;  %1365 = vmatpush3.xpose.msk.msra.mxu1 %vm413_vm1, %v398_v3  ;;  %v400_v10 = vld [vmem:[%s328_s20 + $0x18] sm:$0xff]  ;;  %v411_v11 = vmul.f32 0.35355338, %v395_v6  ;;  %v412_v12 = vmul.f32 0.35355338, %v396_v9  ;;  %v405_v13 = vld [vmem:[%s2058_s25] sm:$0xff] }
  0xa0   : > { %1369 = vmatprep.subr.mxu0 %v1753_v0  ;;  %1374 = vmatprep.subr.mxu1 %v1753_v0  ;;  %v406_v14 = vld [vmem:[%s2058_s25 + $0x8] sm:$0xff]  ;;  %vm718_vm2 = vcmp.ne.s32.totalorder %v405_v13, 0  ;;  %v407_v15 = vld [vmem:[%s2058_s25 + $0x10] sm:$0xff]  ;;  %v408_v18 = vld [vmem:[%s2058_s25 + $0x18] sm:$0xff]  ;;  %s1107_s26 = sshll.u32 %s392_s24, 4  ;;  %s1076_s13 = scalar_lea.sflag [#allocation12], %s2034_s29  ;;  %s2133_s26 = int_to_ptr.vmem [resolvable:$true] %s1107_s26 }
  0xa1   : > { %vm719_vm3 = vcmp.ne.s32.totalorder %v406_v14, 0  ;;  %vm720_vm4 = vcmp.ne.s32.totalorder %v407_v15, 0  ;;  %vm721_vm5 = vcmp.ne.s32.totalorder %v408_v18, 0  ;;  %v401_v53 = vld [vmem:[%s2054_s7] sm:$0xff]  ;;  %v402_v54 = vld [vmem:[%s2054_s7 + $0x8] sm:$0xff]  ;;  %v403_v61 = vld [vmem:[%s2054_s7 + $0x10] sm:$0xff] }
  0xa2   : > { %1362 = vmatmul.mubr.msk.f32.vlgmr.msra.gmra.mrb[0].mxu0 %vm413_vm1, %v409_v4  ;;  %1367 = vmatmul.mubr.msk.f32.vlgmr.msra.gmra.mrb[0].mxu1 %vm413_vm1, %v410_v8  ;;  %v404_v2 = vld [vmem:[%s2054_s7 + $0x18] sm:$0xff]  ;;  %s1623_s11 = scalar_lea.vmem %s2133_s26, 512  ;;  %p2267_p1 = scmp.ne.s32.totalorder %s2252_s6, 0 }
  0xa3   : > { %1370 = vmatpush3.xpose.msk.msra.mxu0 %vm413_vm1, %v399_v7  ;;  %1371 = vmatprep.mubr.msk.f32.mxu0 %vm1754_vm0, %v1753_v0  ;;  %p1624_p0 = scmp.ne.s32.totalorder %s2133_s26, %s1623_s11  ;;  %s1755_s28 = smov [#allocation11]  }
  0xa4   : > { %1375 = vmatpush3.xpose.msk.msra.mxu1 %vm413_vm1, %v400_v10  ;;  %1376 = vmatprep.mubr.msk.f32.mxu1 %vm1754_vm0, %v1753_v0  ;;  %s1627_s10 = sshll.u32 %s1755_s28, 4  ;;  %s1628_s10 = int_to_ptr.vmem [resolvable:$false] %s1627_s10 }
  0xa5   : > { %1379 = vmatprep.subr.mxu0 %v1753_v0  ;;  %1384 = vmatprep.subr.mxu1 %v1753_v0  ;;  %p1625_p6 = pnand %p1624_p0, %p2267_p1  ;;  %s1629_s15 = scalar_lea.vmem %s1628_s10, 1024 }
  0xa6   : > { %1372 = vmatmul.mubr.msk.f32.vlgmr.msra.gmra.mrb[2].mxu0 %vm413_vm1, %v411_v11  ;;  %p1630_p11 = scmp.lt.s32.totalorder %s2133_s26, %s1628_s10  ;;  %p1631_p2 = scmp.lt.s32.totalorder %s1629_s15, %s1623_s11 }
  0xa7   : > { %1377 = vmatmul.mubr.msk.f32.vlgmr.msra.gmra.mrb[2].mxu1 %vm413_vm1, %v412_v12  ;;  %1381 = vmatprep.mubr.msk.f32.mxu0 %vm1754_vm0, %v1753_v0  ;;  %p1626_p13 = pneg %p1625_p6 }
  0xa8   : > { %1386 = vmatprep.mubr.msk.f32.mxu1 %vm1754_vm0, %v1753_v0  ;;  %1380 = vmatpush3.msra.mxu0 %v401_v53  ;;  %p1632_p5 = por %p1631_p2, %p1630_p11 }
  0xa9   : > { %1389 = vmatprep.subr.mxu0 %v1753_v0  ;;  %1385 = vmatpush3.msra.mxu1 %v402_v54 }
  0xaa   : > { %1394 = vmatprep.subr.mxu1 %v1753_v0  ;;  %p1633_p7 = pnand %p1632_p5, %p1626_p13 }
 0x175   : > { %v486_v16 = vpop.f32.mrb[0].mxu0  ;;  %v562_v17 = vpop.f32.mrb[0].mxu1 }
 0x176   : > { %v722_v19 = vsel %vm718_vm2, -1e+09, %v486_v16  ;;  %v1363_v20 = vpop.f32.mrb[1].mxu0  ;;  %v723_v21 = vsel %vm719_vm3, -1e+09, %v562_v17  ;;  %v1368_v22 = vpop.f32.mrb[1].mxu1 }
 0x177   : > { %v726_v23 = vsel %vm413_vm1, %v722_v19, -inf  ;;  %v729_v25 = vsel %vm413_vm1, %v723_v21, -inf }
 0x178   : > { %727 = vmax.xlane.f32.xlu0 %v726_v23 }
 0x179   : > { %v638_v24 = vpop.f32.mrb[2].mxu0 }
 0x17a   : > { %v724_v26 = vsel %vm720_vm4, -1e+09, %v638_v24  ;;  %v1373_v27 = vpop.f32.mrb[3].mxu0  ;;  %v714_v28 = vpop.f32.mrb[2].mxu1 }
 0x17b   : > { %v732_v29 = vsel %vm413_vm1, %v724_v26, -inf  ;;  %v725_v30 = vsel %vm721_vm5, -1e+09, %v714_v28  ;;  %v1378_v31 = vpop.f32.mrb[3].mxu1 }
 0x17c   : > { %730 = vmax.xlane.f32.xlu0 %v729_v25  ;;  %733 = vmax.xlane.f32.xlu1 %v732_v29  ;;  %v735_v32 = vsel %vm413_vm1, %v725_v30, -inf }
 0x180   : > { %736 = vmax.xlane.f32.xlu1 %v735_v32 }
 0x205   : > { %v728_v33 = vpop.xlane.xlu0 %727 }
 0x206   : > { %v738_v34 = vsub.f32 %v722_v19, %v728_v33 }
 0x208   : > { %v742_v35 = vmul.f32 1.442695, %v738_v34 }
 0x209   : > { %v731_v36 = vpop.xlane.xlu0 %730  ;;  %v734_v37 = vpop.xlane.xlu1 %733 }
 0x20a   : > { %1487 = vpow2.f32 %v742_v35  ;;  %v739_v38 = vsub.f32 %v723_v21, %v731_v36  ;;  %v740_v39 = vsub.f32 %v724_v26, %v734_v37 }
 0x20c   : > { %v744_v40 = vmul.f32 1.442695, %v739_v38  ;;  %v746_v41 = vmul.f32 1.442695, %v740_v39 }
 0x20d   : > { %v737_v42 = vpop.xlane.xlu1 %736 }
 0x20e   : > { %1489 = vpow2.f32 %v744_v40  ;;  %v741_v43 = vsub.f32 %v725_v30, %v737_v42 }
 0x20f   : > { %1491 = vpow2.f32 %v746_v41 }
 0x210   : > { %v748_v44 = vmul.f32 1.442695, %v741_v43 }
 0x212   : > { %1493 = vpow2.f32 %v748_v44 }
 0x214   : > { %v1488_v45 = vpop.eup %1487 }
 0x215   : > { %v750_v46 = vsel %vm413_vm1, %v1488_v45, 0.0 }
 0x216   : > { %751 = vadd.xlane.f32.xlu0 %v750_v46 }
 0x218   : > { %v1490_v47 = vpop.eup %1489 }
 0x219   : > { %v1492_v48 = vpop.eup %1491  ;;  %v753_v49 = vsel %vm413_vm1, %v1490_v47, 0.0 }
 0x21a   : > { %754 = vadd.xlane.f32.xlu1 %v753_v49  ;;  %v756_v50 = vsel %vm413_vm1, %v1492_v48, 0.0 }
 0x21b   : > { %757 = vadd.xlane.f32.xlu0 %v756_v50 }
 0x21c   : > { %v1494_v51 = vpop.eup %1493 }
 0x21d   : > { %v759_v52 = vsel %vm413_vm1, %v1494_v51, 0.0 }
 0x21e   : > { %760 = vadd.xlane.f32.xlu1 %v759_v52 }
 0x2a3   : > { %v752_v55 = vpop.xlane.xlu0 %751 }
 0x2a4   : > { %1495 = vrcp.f32 %v752_v55 }
 0x2a7   : > { %v755_v56 = vpop.xlane.xlu1 %754 }
 0x2a8   : > { %v758_v57 = vpop.xlane.xlu0 %757  ;;  %1497 = vrcp.f32 %v755_v56 }
 0x2a9   : > { %1499 = vrcp.f32 %v758_v57 }
 0x2ab   : > { %v761_v58 = vpop.xlane.xlu1 %760 }
 0x2ac   : > { %1501 = vrcp.f32 %v761_v58 }
 0x2ae   : > { %v1496_v59 = vpop.eup %1495 }
 0x2af   : > { %v766_v60 = vmul.f32 %v1496_v59, %v1488_v45 }
 0x2b1   : > { %1066 = vst.msk [vmem:[%s392_s24] sm:$0xff] %vm413_vm1, %v766_v60  ;;  %1382 = vmatmul.mubr.msk.f32.vlgmr.msra.gmra.mrb[4].mxu0 %vm413_vm1, %v766_v60 }
 0x2b2   : > { %v1498_v62 = vpop.eup %1497  ;;  %1390 = vmatpush3.msra.mxu0 %v403_v61  ;;  %1391 = vmatprep.mubr.msk.f32.mxu0 %vm1754_vm0, %v1753_v0 }
 0x2b3   : > { %v1500_v63 = vpop.eup %1499  ;;  %v767_v1 = vmul.f32 %v1498_v62, %v1490_v47 }
 0x2b4   : > { %v768_v3 = vmul.f32 %v1500_v63, %v1492_v48 }
 0x2b5   : > { %1067 = vst.msk [vmem:[%s392_s24 + $0x8] sm:$0xff] %vm413_vm1, %v767_v1  ;;  %1387 = vmatmul.mubr.msk.f32.vlgmr.msra.gmra.mrb[4].mxu1 %vm413_vm1, %v767_v1 }
 0x2b6   : > { %v1502_v4 = vpop.eup %1501  ;;  %1068 = vst.msk [vmem:[%s392_s24 + $0x10] sm:$0xff] %vm413_vm1, %v768_v3  ;;  %1392 = vmatmul.mubr.msk.f32.vlgmr.msra.gmra.mrb[6].mxu0 %vm413_vm1, %v768_v3  ;;  %1395 = vmatpush3.msra.mxu1 %v404_v2 }
 0x2b7   : > { %v769_v5 = vmul.f32 %v1502_v4, %v1494_v51  ;;  %1396 = vmatprep.mubr.msk.f32.mxu1 %vm1754_vm0, %v1753_v0 }
 0x2b9   : > { %1069 = vst.msk [vmem:[%s392_s24 + $0x18] sm:$0xff] %vm413_vm1, %v769_v5  ;;  %1397 = vmatmul.mubr.msk.f32.vlgmr.msra.gmra.mrb[6].mxu1 %vm413_vm1, %v769_v5 }
 0x2ba   : > { %1636 = shalt.err (!%p1633_p7)
}
 0x2bb   : > { %s1637_s0 = scalar_lea.hbm %s2131_s27, 512  ;;  %s1641_s16 = scalar_lea.hbm %s2231_s5, 1024 }
 0x2bc   : > { %p1638_p3 = scmp.ne.s32.totalorder %s2131_s27, %s1637_s0  ;;  %p1642_p12 = scmp.lt.u32.totalorder %s2131_s27, %s2231_s5 }
 0x2bd   : > { %p1643_p4 = scmp.lt.u32.totalorder %s1641_s16, %s1637_s0  ;;  %p1645_p0 = scmp.lt.u32.totalorder %s1637_s0, %s2131_s27 }
 0x2be   : > { %p1639_p10 = pnand %p1638_p3, %p2267_p1 }
 0x2bf   : > { %p1644_p8 = por %p1643_p4, %p1642_p12 }
 0x2c0   : > { %p1640_p9 = pneg %p1639_p10 }
 0x2c1   : > { %p1646_p6 = por %p1645_p0, %p1644_p8 }
 0x2c3   : > { %p1647_p13 = pnand %p1646_p6, %p1640_p9 }
 0x2c5   : > { %1650 = shalt.err (!%p1647_p13)
}
 0x2c6   : > { %s1756_s20 = smov 128   ;;  %s1757_s7 = smov 8  }
 0x2c7   : > { %1408 = dma.vmem_to_hbm [thread:$0]  (%p2267_p1), %s2133_s26, 512, %s2131_s27, %s1076_s13, %s1756_s20, %s1756_s20, %s1757_s7  }
 0x2c8   : > { %s385_s22 = scalar_lea.vmem [#allocation10], %s2037_s14  ;;  %s2173_s23 = scalar_lea.hbm %s2230_s4, %s1341_s30 }
 0x2c9   : > { %s1090_s25 = sshll.u32 %s385_s22, 4  ;;  %s1071_s1 = scalar_lea.sflag [#allocation4], %s2034_s29  ;;  %s2165_s25 = int_to_ptr.vmem [resolvable:$true] %s1090_s25 }
 0x2ca   : > { %s1651_s27 = scalar_lea.vmem %s2165_s25, 512  ;;  %s1758_s26 = smov [#allocation10]  }
 0x2cb   : > { %p1652_p11 = scmp.ne.s32.totalorder %s2165_s25, %s1651_s27  ;;  %s1655_s13 = sshll.u32 %s1758_s26, 4  ;;  %s1656_s13 = int_to_ptr.vmem [resolvable:$false] %s1655_s13 }
 0x2cc   : > { %s1657_s11 = scalar_lea.vmem %s1656_s13, 1024  ;;  %p1658_p7 = scmp.lt.s32.totalorder %s2165_s25, %s1656_s13 }
 0x2cd   : > { %p1653_p2 = pnand %p1652_p11, %p2267_p1  ;;  %p1659_p3 = scmp.lt.s32.totalorder %s1657_s11, %s1651_s27 }
 0x2cf   : > { %p1654_p5 = pneg %p1653_p2  ;;  %p1660_p10 = por %p1659_p3, %p1658_p7 }
 0x2d1   : > { %p1661_p9 = pnand %p1660_p10, %p1654_p5 }
 0x384   : > { %v839_v0 = vpop.f32.mrb[4].mxu0 }
 0x385   : > { %1062 = vst.msk [vmem:[%s385_s22] sm:$0xff] %vm413_vm1, %v839_v0  ;;  %v1383_v6 = vpop.f32.mrb[5].mxu0 }
 0x388   : > { %v912_v7 = vpop.f32.mrb[4].mxu1 }
 0x389   : > { %1063 = vst.msk [vmem:[%s385_s22 + $0x8] sm:$0xff] %vm413_vm1, %v912_v7  ;;  %v985_v8 = vpop.f32.mrb[6].mxu0  ;;  %v1388_v9 = vpop.f32.mrb[5].mxu1 }
 0x38a   : > { %1064 = vst.msk [vmem:[%s385_s22 + $0x10] sm:$0xff] %vm413_vm1, %v985_v8  ;;  %v1393_v10 = vpop.f32.mrb[7].mxu0 }
 0x38c   : > { %v1058_v11 = vpop.f32.mrb[6].mxu1 }
 0x38d   : > { %1065 = vst.msk [vmem:[%s385_s22 + $0x18] sm:$0xff] %vm413_vm1, %v1058_v11  ;;  %v1398_v12 = vpop.f32.mrb[7].mxu1 }
 0x38e   : > { %1664 = shalt.err (!%p1661_p9)
}
 0x38f   : > { %s1665_s21 = scalar_lea.hbm %s2173_s23, 512  ;;  %s1669_s10 = scalar_lea.hbm %s2230_s4, 1024 }
 0x390   : > { %p1666_p12 = scmp.ne.s32.totalorder %s2173_s23, %s1665_s21  ;;  %p1670_p0 = scmp.lt.u32.totalorder %s2173_s23, %s2230_s4 }
 0x391   : > { %p1671_p6 = scmp.lt.u32.totalorder %s1669_s10, %s1665_s21  ;;  %p1673_p11 = scmp.lt.u32.totalorder %s1665_s21, %s2173_s23 }
 0x392   : > { %p1667_p4 = pnand %p1666_p12, %p2267_p1 }
 0x393   : > { %p1672_p13 = por %p1671_p6, %p1670_p0 }
 0x394   : > { %p1668_p8 = pneg %p1667_p4 }
 0x395   : > { %p1674_p2 = por %p1673_p11, %p1672_p13 }
 0x397   : > { %p1675_p5 = pnand %p1674_p2, %p1668_p8 }
 0x399   : > { %1678 = shalt.err (!%p1675_p5)
}
 0x39a   : > { %1407 = dma.vmem_to_hbm [thread:$0]  (%p2267_p1), %s2165_s25, 512, %s2173_s23, %s1071_s1, %s1756_s20, %s1756_s20, %s1757_s7  }
 0x39b PF: > { %s2268_s8 = sld [smem:[#allocation23_spill]]  ;;  %s2269_s12 = sld [smem:[#allocation20_spill]] }
 0x39c   : > { %s1122_s16 = sand.u32 1, %s1725_s18  }
 0x39d   : > { %s1123_s9 = scalar_lea.sflag [#allocation4], %s1122_s16 }
 0x3a1   : > { %p2270_p7 = scmp.ne.s32.totalorder %s2268_s8, 0  ;;  %p2271_p3 = scmp.ge.s32.totalorder %s2269_s12, 2 }
 0x3a3   : > { %p1425_p10 = pnand %p2271_p3, %p2270_p7 }
 0x3a5   : > { %1716 = dma.done.wait (!%p1425_p10), %s1123_s9, 512  }
 0x3a6   : > { %1718 = vsyncadd (!%p1425_p10), %s1123_s9, 4294966784  ;;  %s1132_s6 = scalar_lea.sflag [#allocation12], %s1122_s16 }
 0x3a7   : > { %1720 = dma.done.wait (!%p1425_p10), %s1132_s6, 512  }
 0x3a8   : > { %1722 = vsyncadd (!%p1425_p10), %s1132_s6, 4294966784  ;;  %s31_s23 = sadd.s32 1, %s2269_s12   ;;  %s2272_s29 = sld [smem:[#allocation18_spill]] }
 0x3a9   : > { %p28_p9 = scmp.ge.s32.totalorder %s31_s23, 4   ;;  %s2273_s20 = sld [smem:[#allocation22_spill]] }
 0x3aa   : > { %s2274_s21 = sld [smem:[#allocation19_spill]]  ;;  %s2275_s22 = sld [smem:[#allocation21_spill]] }
 0x3ab   : > { %s2276_s18 = smov %s1729_s19  ;;  %30 = sbr.rel (!%p28_p9) target bundleno = 15 (0xf), region = 135 }
 0x3ae   : > { %s2277_s19 = smov %s2272_s29 }
 0x3b2   :  { %1137 = vsyncpa [#allocation3], 1 }
 0x3b3   :  { %1139 = vsyncpa [#allocation3 + $0x1], 1 }
 0x3b4   :  { %1140 = vsyncpa [#allocation6], 1 }
 0x3b5   :  { %1142 = vsyncpa [#allocation6 + $0x1], 1 }
 0x3b6   :  { %1143 = vsyncpa [#allocation9], 1 }
 0x3b7   :  { %1145 = vsyncpa [#allocation9 + $0x1], 1 }
 0x3b8   :  { %1146 = vsyncpa [#allocation4], 1 }
 0x3b9   :  { %1148 = vsyncpa [#allocation4 + $0x1], 1 }
 0x3ba   :  { %1149 = vsyncpa [#allocation12], 1 }
 0x3bb   :  { %1151 = vsyncpa [#allocation12 + $0x1], 1 }

</bundles_post_ra>
